<compile_context>
chip_gen: v7x
topology: tpu7x:2x2x1
jax: 0.10.0
libtpu: 0.0.40
codegen_flags: <defaults>
</compile_context>

<pallas_src>
import jax
import jax.numpy as jnp
from jax.experimental import pallas as pl
from jax.experimental.pallas import tpu as pltpu

_LANE = 128                              # vreg lane width
_SUB_ROWS = 512                          # rows per in-kernel compute chunk (256 KiB f32)
_TARGET_BLOCK_BYTES = 8 * 1024 * 1024    # per pipeline buffer (Pallas double-buffers)
_VMEM_LIMIT_BYTES = 32 * 1024 * 1024
_LN2 = 0.6931471805599453


def _round_down16(v: int) -> int:
    return (v // 16) * 16


def _num_parallel_cores() -> int:
    """TensorCores reachable from one JAX device via a 'parallel' grid axis."""
    # TODO(synk): verify on v7x that a plain "parallel" axis shards across the
    # two TensorCores; if not, switch that axis to pltpu.CORE_PARALLEL.
    try:
        kind = jax.devices()[0].device_kind.lower()
    except Exception:
        return 1
    # Megacore (v4/v5p) and dual-TC (v7x) chips; v2/v3/v5e/v6e expose 1 TC/device.
    if any(tag in kind for tag in ("v4", "v5p", "v7", "7x")):
        return 2
    return 1


def _make_kernel(rows, block_rows, sub_rows, blocks_per_core, needs_mask, grouped):
    n_sub = block_rows // sub_rows

    def _chunk_logsum(xc):
        """Per-lane sum of log over a (sub_rows, 128) f32 chunk -> (1, 128) f32."""
        if not grouped:
            return jnp.sum(jnp.log(xc), axis=0, keepdims=True)
        # Grouped product-before-log (assumes positive, normal, finite inputs,
        # i.e. probabilities):  log(x) = log(mantissa) + (exp - 127) * ln2.
        bits = pltpu.bitcast(xc, jnp.int32)
        exps = jnp.bitwise_and(jnp.right_shift(bits, 23), 0xFF) - 127
        mant = pltpu.bitcast(
            jnp.bitwise_or(jnp.bitwise_and(bits, 0x007FFFFF), 0x3F800000),
            jnp.float32)                                     # in [1, 2)
        # Fold 8 sublane rows per group with tile-aligned half-slices:
        # product of 8 mantissas stays < 256 -> exact-enough in f32.
        r = sub_rows
        for _ in range(3):
            r //= 2
            mant = mant[:r, :] * mant[r:, :]
            exps = exps[:r, :] + exps[r:, :]
        return jnp.sum(jnp.log(mant) + exps.astype(jnp.float32) * _LN2,
                       axis=0, keepdims=True)

    def kernel(x_ref, o_ref, acc_ref):
        p = pl.program_id(0)   # core shard ("parallel")
        k = pl.program_id(1)   # row-block within the shard ("arbitrary")

        @pl.when(k == 0)
        def _init():
            acc_ref[...] = jnp.zeros_like(acc_ref)

        if needs_mask:
            # Unclamped logical start (the DMA index_map is clamped separately),
            # so clamped duplicate blocks are fully masked out.
            block_start = (p * blocks_per_core + k) * block_rows

        @pl.loop(0, n_sub)
        def _sub(c):
            r0 = pl.multiple_of(c * sub_rows, sub_rows)
            xc = x_ref[pl.ds(r0, sub_rows), :].astype(jnp.float32)

            if needs_mask:
                chunk_start = block_start + c * sub_rows
                is_edge = chunk_start + sub_rows > rows

                @pl.when(jnp.logical_not(is_edge))
                def _interior():
                    acc_ref[...] += _chunk_logsum(xc)

                @pl.when(is_edge)
                def _edge():
                    # Mask rows past the true extent with 1.0 BEFORE the log so
                    # garbage lanes contribute exactly log(1) = 0 (never NaN).
                    row_ids = chunk_start + jax.lax.broadcasted_iota(
                        jnp.int32, (sub_rows, _LANE), 0)
                    acc_ref[...] += _chunk_logsum(
                        jnp.where(row_ids < rows, xc, 1.0))
            else:
                acc_ref[...] += _chunk_logsum(xc)

        @pl.when(k == pl.num_programs(1) - 1)
        def _finalize():
            o_ref[...] = acc_ref[...].reshape(1, 1, _LANE)

    return kernel


def entropy_loss(output: jax.Array, *, max_block_rows: int | None = None) -> jax.Array:
    """sum(log(output)) over all elements, computed in a Pallas TPU kernel."""
    x = output.reshape(-1)                 # free reshape of a contiguous array
    n = x.shape[0]

    # Lane remainder (< 128 elements): handled in plain JAX.
    # TODO(synk): XLA may materialize the prefix slice below as a copy for
    # non-128-multiple sizes; an in-kernel ragged-lane mask over a 1-D view
    # would avoid that extra HBM pass.
    rem = n % _LANE
    tail = jnp.float32(0.0)
    if rem:
        tail = jnp.sum(jnp.log(x[n - rem:].astype(jnp.float32)))
        x = x[: n - rem]
    rows = (n - rem) // _LANE
    if rows == 0:
        return tail
    x2 = x.reshape(rows, _LANE)            # zero-copy lane-dense view

    # Byte-budgeted DMA block (same bytes for f32 and bf16) + small compute chunk.
    itemsize = x2.dtype.itemsize
    cap_rows = _TARGET_BLOCK_BYTES // (_LANE * itemsize)
    if max_block_rows is not None:
        cap_rows = min(cap_rows, max_block_rows)
    cap_rows = max(16, _round_down16(cap_rows))

    sub_rows = max(16, _round_down16(min(_SUB_ROWS, cap_rows, rows)))
    subs_per_block = max(1, min(cap_rows // sub_rows, pl.cdiv(rows, sub_rows)))
    block_rows = sub_rows * subs_per_block

    total_blocks = pl.cdiv(rows, block_rows)
    nc = min(_num_parallel_cores(), total_blocks)
    blocks_per_core = pl.cdiv(total_blocks, nc)

    # Mask needed iff the last block is ragged or a core steps past the final
    # block (that duplicate block is clamped for the DMA and fully masked).
    needs_mask = (rows % block_rows != 0) or (nc * blocks_per_core != total_blocks)
    grouped = (sub_rows % 64 == 0)   # 8-element product-before-log grouping

    if nc * blocks_per_core == total_blocks:
        def in_map(p, k):
            return (p * blocks_per_core + k, 0)
    else:
        def in_map(p, k):
            return (jnp.minimum(p * blocks_per_core + k, total_blocks - 1), 0)

    kernel = _make_kernel(rows, block_rows, sub_rows, blocks_per_core,
                          needs_mask, grouped)

    out = pl.pallas_call(
        kernel,
        out_shape=jax.ShapeDtypeStruct((nc, 1, _LANE), jnp.float32),
        grid=(nc, blocks_per_core),
        in_specs=[pl.BlockSpec((block_rows, _LANE), in_map)],
        out_specs=pl.BlockSpec((1, 1, _LANE), lambda p, k: (p, 0, 0)),
        scratch_shapes=[pltpu.VMEM((1, _LANE), jnp.float32)],
        compiler_params=pltpu.CompilerParams(
            dimension_semantics=("parallel", "arbitrary"),
            vmem_limit_bytes=_VMEM_LIMIT_BYTES),
        cost_estimate=pl.CostEstimate(
            flops=rows * _LANE,
            transcendentals=(rows * _LANE) // (8 if grouped else 1),
            bytes_accessed=rows * _LANE * itemsize),
    )(x2)

    # Tiny final reduction over the per-core / per-lane partials.
    return jnp.sum(out) + tail


if __name__ == "__main__":
    key = jax.random.PRNGKey(0)
    k1, k2, k3, k4, k5 = jax.random.split(key, 5)

    def check(x, **kw):
        loss = jax.block_until_ready(entropy_loss(x, **kw))
        ref = jnp.sum(jnp.log(x.astype(jnp.float32)))
        assert jnp.allclose(loss, ref, rtol=1e-5, atol=1e-3), (loss, ref, x.shape, kw)

    # Primary check: small NCHW-style "output" (strictly positive, e.g. softmax
    # probabilities), as the module's forward implies.
    check(jax.random.uniform(k1, (2, 4, 16, 16), jnp.float32, 0.05, 1.0))

    # Grouped (product-before-log) path, single block, no masking.
    check(jax.random.uniform(k2, (8, 64, 128), jnp.float32, 0.05, 1.0))

    # Grouped path + ragged last block (+ clamped duplicate block on 2-TC chips).
    check(jax.random.uniform(k3, (2, 80, 128), jnp.float32, 0.05, 1.0),
          max_block_rows=64)

    # Plain-log path, multi-block, ragged last block, gated masking.
    check(jax.random.uniform(k4, (3, 24, 128), jnp.float32, 0.05, 1.0),
          max_block_rows=16)

    # Non-lane-aligned size: <128-element tail handled in plain JAX.
    check(jax.random.uniform(k5, (1, 2053), jnp.float32, 0.05, 1.0),
          max_block_rows=16)

    print("KERNEL_OK")
</pallas_src>

<mosaic_0001>
module attributes {stable_mosaic.version = 11 : i64} {
  func.func @kernel(%arg0: i32, %arg1: i32, %arg2: memref<16x128xf32, #tpu.memory_space<vmem>>, %arg3: memref<1x1x128xf32, #tpu.memory_space<vmem>>, %arg4: memref<1x128xf32, #tpu.memory_space<vmem>>) attributes {dimension_semantics = [#tpu.dimension_semantics<parallel>, #tpu.dimension_semantics<arbitrary>], iteration_bounds = array<i64: 1, 1>, scalar_prefetch = 0 : i64, scratch_operands = 1 : i64, tpu.core_type = #tpu.core_type<tc>, window_params = [{transform_indices = @transform_0, window_bounds = array<i64: 16, 128>}, {transform_indices = @transform_1, window_bounds = array<i64: 1, 1, 128>}]} {
    %c0_i32 = arith.constant 0 : i32
    %0 = arith.cmpi eq, %arg1, %c0_i32 : i32
    %1 = arith.extui %0 : i1 to i32
    %c0_i32_0 = arith.constant 0 : i32
    %2 = arith.cmpi ne, %1, %c0_i32_0 : i32
    scf.if %2 {
      %cst_10 = arith.constant 0.000000e+00 : f32
      %18 = vector.broadcast %cst_10 : f32 to vector<1x128xf32>
      %c0_11 = arith.constant 0 : index
      %c0_12 = arith.constant 0 : index
      %19 = vector.load %arg4[%c0_11, %c0_12] : memref<1x128xf32, #tpu.memory_space<vmem>>, vector<1x128xf32>
      tpu.vector_store %arg4[%c0_11, %c0_12], %18 {strides = array<i32>} : memref<1x128xf32, #tpu.memory_space<vmem>>, vector<1x128xf32>,
    } else {
    }
    %c0_i32_1 = arith.constant 0 : i32
    %c1_i32 = arith.constant 1 : i32
    %3 = arith.muli %c0_i32_1, %c1_i32 : i32
    %c0_i32_2 = arith.constant 0 : i32
    %4 = arith.addi %c0_i32_2, %3 : i32
    %c16_i32 = arith.constant 16 : i32
    %5 = arith.muli %4, %c16_i32 : i32
    %6 = tpu.assume_multiple %5, 16 : i32
    %7 = arith.index_cast %6 : i32 to index
    %c0 = arith.constant 0 : index
    %8 = vector.load %arg2[%7, %c0] : memref<16x128xf32, #tpu.memory_space<vmem>>, vector<16x128xf32>
    %c0_3 = arith.constant 0 : index
    %c0_4 = arith.constant 0 : index
    %9 = vector.load %arg4[%c0_3, %c0_4] : memref<1x128xf32, #tpu.memory_space<vmem>>, vector<1x128xf32>
    %10 = math.log %8 : vector<16x128xf32>
    %cst = arith.constant dense<0.000000e+00> : vector<128xf32>
    %11 = vector.multi_reduction <add>, %10, %cst [0] : vector<16x128xf32> to vector<128xf32>
    %12 = vector.shape_cast %11 : vector<128xf32> to vector<1x128xf32>
    %13 = arith.addf %9, %12 : vector<1x128xf32>
    %c0_5 = arith.constant 0 : index
    %c0_6 = arith.constant 0 : index
    %14 = vector.load %arg4[%c0_5, %c0_6] : memref<1x128xf32, #tpu.memory_space<vmem>>, vector<1x128xf32>
    tpu.vector_store %arg4[%c0_5, %c0_6], %13 {strides = array<i32>} : memref<1x128xf32, #tpu.memory_space<vmem>>, vector<1x128xf32>,
    %c1_i32_7 = arith.constant 1 : i32
    %c0_i32_8 = arith.constant 0 : i32
    %15 = arith.cmpi eq, %arg1, %c0_i32_8 : i32
    %16 = arith.extui %15 : i1 to i32
    %c0_i32_9 = arith.constant 0 : i32
    %17 = arith.cmpi ne, %16, %c0_i32_9 : i32
    scf.if %17 {
      %c0_10 = arith.constant 0 : index
      %c0_11 = arith.constant 0 : index
      %18 = vector.load %arg4[%c0_10, %c0_11] : memref<1x128xf32, #tpu.memory_space<vmem>>, vector<1x128xf32>
      %19 = vector.shape_cast %18 : vector<1x128xf32> to vector<1x1x128xf32>
      %c0_12 = arith.constant 0 : index
      %c0_13 = arith.constant 0 : index
      %c0_14 = arith.constant 0 : index
      %20 = vector.load %arg3[%c0_12, %c0_13, %c0_14] : memref<1x1x128xf32, #tpu.memory_space<vmem>>, vector<1x1x128xf32>
      tpu.vector_store %arg3[%c0_12, %c0_13, %c0_14], %19 {strides = array<i32>} : memref<1x1x128xf32, #tpu.memory_space<vmem>>, vector<1x1x128xf32>,
    } else {
    }
    return
  }
  func.func @transform_0(%arg0: i32, %arg1: i32) -> (i32, i32) {
    %c1_i32 = arith.constant 1 : i32
    %0 = arith.muli %arg0, %c1_i32 : i32
    %1 = arith.addi %0, %arg1 : i32
    %c0_i32 = arith.constant 0 : i32
    %c0_i32_0 = arith.constant 0 : i32
    return %1, %c0_i32 : i32, i32
  }
  func.func @transform_1(%arg0: i32, %arg1: i32) -> (i32, i32, i32) {
    %c0_i32 = arith.constant 0 : i32
    %c0_i32_0 = arith.constant 0 : i32
    %c0_i32_1 = arith.constant 0 : i32
    return %arg0, %c0_i32, %c0_i32_0 : i32, i32, i32
  }
}

</mosaic_0001>

<bundles_post_ra>
// kernel: tpu_custom_call.1
= control target key start
LH: loop header
LB: loop body
LE: loop exit
PB: predicated region body
PF: predicated region fallthrough
CT: control target
= control target key end

     0   :  { %6 = vsyncpa [#allocation4], 0  ;;  %s166_s0 = inlined_call_operand.hbm [shape: f32[16,128], index: 0, kind: input, shape index: {}]   ;;  %s167_s1 = inlined_call_operand.hbm [shape: f32[1,1,128], index: 1, kind: output, shape index: {}]  }
   0x1   :  { %7 = vsyncpa [#allocation5], 0  ;;  %s127_s6 = smov [#allocation3]   ;;  %s79_s10 = scalar_lea.hbm %s166_s0, 256 }
   0x2   :  { %s17_s7 = sshll.u32 %s127_s6, 4  ;;  %p80_p0 = scmp.ne.s32.totalorder %s166_s0, %s79_s10  ;;  %s18_s7 = int_to_ptr.vmem [resolvable:$true] %s17_s7 }
   0x3   :  { %p83_p1 = scmp.lt.u32.totalorder %s79_s10, %s166_s0 }
   0x5   :  { %p85_p2 = pnand %p83_p1, %p80_p0 }
   0x7   :  { %88 = shalt.err (!%p85_p2)
}
   0x8   :  { %s89_s15 = scalar_lea.vmem %s18_s7, 256  ;;  %p94_p4 = scmp.lt.s32.totalorder %s18_s7, %s18_s7 }
   0x9   :  { %p90_p3 = scmp.ne.s32.totalorder %s18_s7, %s89_s15  ;;  %p95_p5 = scmp.lt.s32.totalorder %s89_s15, %s89_s15 }
   0xb   :  { %p96_p6 = por %p95_p5, %p94_p4 }
   0xd   :  { %p97_p7 = pnand %p96_p6, %p90_p3 }
   0xf   :  { %100 = shalt.err (!%p97_p7)
}
  0x10   :  { %s128_s16 = smov 128   ;;  %s129_s17 = smov 8  }
  0x11   :  { %23 = dma.hbm_to_vmem [thread:$0]  %s166_s0, 256, %s18_s7, [#allocation4], %s128_s16, %s128_s16, %s129_s17  }
  0x12   :  { %123 = dma.done.wait [#allocation4], 256  }
  0x13   :  { %124 = vsyncadd [#allocation4], 4294967040  ;;  %v130_v0 = vmov 0.0   ;;  %v34_v1 = vld [vmem:[#allocation3] sm:$0xff]  ;;  %v35_v2 = vld [vmem:[#allocation3 + $0x8] sm:$0xff]  ;;  %s131_s0 = smov [#allocation6]  }
  0x14   :  { %33 = vst [vmem:[#allocation2] sm:$0x1] %v130_v0  ;;  %75 = vlog2.f32 %v34_v1  ;;  %s61_s20 = sshll.u32 %s131_s0, 4  ;;  %s62_s20 = int_to_ptr.vmem [resolvable:$true] %s61_s20 }
  0x15   :  { %77 = vlog2.f32 %v35_v2  ;;  %s101_s21 = scalar_lea.vmem %s62_s20, 16  ;;  %s105_s22 = scalar_lea.vmem %s62_s20, 32 }
  0x16   :  { %p102_p8 = scmp.ne.s32.totalorder %s62_s20, %s101_s21  ;;  %p106_p9 = scmp.lt.s32.totalorder %s62_s20, %s62_s20 }
  0x17   :  { %p107_p10 = scmp.lt.s32.totalorder %s105_s22, %s101_s21 }
  0x19   :  { %p108_p11 = por %p107_p10, %p106_p9 }
  0x1b   :  { %v36_v13 = vld [vmem:[#allocation2] sm:$0x1]  ;;  %p109_p12 = pnand %p108_p11, %p102_p8 }
  0x1e   :  { %v76_v3 = vpop.eup %75 }
  0x1f   :  { %v78_v4 = vpop.eup %77  ;;  %v38_v5 = vmul.f32 0.6931472, %v76_v3 }
  0x20   :  { %v40_v6 = vmul.f32 0.6931472, %v78_v4 }
  0x22   :  { %v41_v7 = vadd.f32 %v40_v6, %v38_v5 }
  0x24   :  { %v42_v8 = vrot.slane %v41_v7, 4 }
  0x26   :  { %v43_v9 = vadd.f32 %v42_v8, %v41_v7 }
  0x28   :  { %v44_v10 = vrot.slane %v43_v9, 2 }
  0x2a   :  { %v45_v11 = vadd.f32 %v44_v10, %v43_v9 }
  0x2c   :  { %v46_v12 = vrot.slane %v45_v11, 1 }
  0x2e   :  { %v47_v14 = vadd.f32 %v46_v12, %v45_v11 }
  0x30   :  { %v48_v15 = vadd.f32 %v47_v14, %v36_v13 }
  0x32   :  { %49 = vst [vmem:[#allocation2] sm:$0x1] %v48_v15 }
  0x39   :  { %v53_v16 = vld [vmem:[#allocation2] sm:$0x1] }
  0x3a   :  { %54 = vst [vmem:[#allocation6] sm:$0x1] %v53_v16 }
  0x3b   :  { %112 = shalt.err (!%p109_p12)
}
  0x3c   :  { %s113_s25 = scalar_lea.hbm %s167_s1, 16 }
  0x3d   :  { %p114_p13 = scmp.ne.s32.totalorder %s167_s1, %s113_s25  ;;  %p117_p0 = scmp.lt.u32.totalorder %s113_s25, %s167_s1 }
  0x3f   :  { %p119_p1 = pnand %p117_p0, %p114_p13 }
  0x41   :  { %122 = shalt.err (!%p119_p1)
}
  0x42   :  { %64 = dma.vmem_to_hbm [thread:$0]  %s62_s20, 16, %s167_s1, [#allocation5]  }
  0x43   :  { %125 = dma.done.wait [#allocation5], 16  }
  0x44   :  { %126 = vsyncadd [#allocation5], 4294967280 }
  0x45   :  { %68 = vsyncpa [#allocation4], 1 }
  0x46   :  { %69 = vsyncpa [#allocation5], 1 }

</bundles_post_ra>
